<compile_context>
chip_gen: v6e
topology: v6e:2x2x1
jax: 0.10.0
libtpu: 0.0.40
codegen_flags: <defaults>
</compile_context>

<pallas_src>
import functools

import jax
import jax.numpy as jnp
from jax.experimental import pallas as pl
from jax.experimental.pallas import tpu as pltpu

LANE = 128      # vreg lane width   -> lane-dense HBM tiles
SUBLANE = 8     # f32 sublane count -> row-padding granularity


def _round_up(x, m):
    return ((x + m - 1) // m) * m


def _pad2(x, rows, cols):
    r, c = x.shape
    return jnp.pad(x, ((0, rows - r), (0, cols - c)))


# ----------------------------------------------------------------------------
# Fused forward kernel.
#
# Online (hypergraph) branch:
#   e        = relu(edge_fea @ W_h + b_h)            (online_encoder)
#   e        = e @ W_p + b_p                         (predictor)
#   gathered = onehot(hyper_edge_index[0]) @ e       (gather, on the MXU)
#   h_n_1[b] = sum_{i: idx1[i]==node_base+b} gathered[i] / (count + 1)
#       == scatter_reduce_(0, 'mean', include_self=True) on zeros, restricted
#          to the batch-node rows node_emb_1[-batch_size:].
#
# Target (graph) branch (no-grad in the reference):
#   node_emb_2 = relu(x @ W_g + b_g)                 (target_encoder)
#   h_n_2      = node_emb_2[:batch_size]
#   h_sub_2    = MyReadout(node_emb_2[:-batch_size], batch, 'mean')
# ----------------------------------------------------------------------------
def _bourne_fused_kernel(edge_fea_ref, w_h_ref, b_h_ref, w_p_ref, b_p_ref,
                         eidx_ref, nidx_ref,
                         x2_ref, w_g_ref, b_g_ref, bidx_ref,
                         hn1_ref, hn2_ref, hsub2_ref, *, node_base):
    f32 = jnp.float32

    # ------------------- online (hypergraph) branch -------------------
    # online_encoder: dense + ReLU.  TODO(synk): opaque GNN encoder -> dense.
    e = jnp.dot(edge_fea_ref[...], w_h_ref[...], preferred_element_type=f32)
    e = jnp.maximum(e + b_h_ref[...], 0.0)
    # predictor: dense
    e = jnp.dot(e, w_p_ref[...], preferred_element_type=f32) + b_p_ref[...]

    # edge_emb_1[hyper_edge_index[0]] as a one-hot matmul (stays in VMEM,
    # uses the otherwise-idle MXU instead of an XLA gather + HBM roundtrip).
    m_pad = eidx_ref.shape[0]
    ne_pad = edge_fea_ref.shape[0]
    gcols = jax.lax.broadcasted_iota(jnp.int32, (m_pad, ne_pad), 1)
    gmask = (eidx_ref[...] == gcols).astype(f32)               # (m_pad, ne_pad)
    gathered = jnp.dot(gmask, e, preferred_element_type=f32)   # (m_pad, LANE)

    # scatter_reduce_('mean', include_self=True, zero init) => divisor count+1,
    # computed only for the batch nodes node_base .. node_base + bs - 1.
    # Padded incidences carry node id -1 and therefore never match.
    bs1_pad = hn1_ref.shape[0]
    rows1 = jax.lax.broadcasted_iota(jnp.int32, (bs1_pad, m_pad), 0) + node_base
    nmask = (nidx_ref[...] == rows1).astype(f32)               # (bs1_pad, m_pad)
    sums1 = jnp.dot(nmask, gathered, preferred_element_type=f32)
    cnt1 = jnp.sum(nmask, axis=-1, keepdims=True)              # XLU slot (idle)
    hn1_ref[...] = sums1 / (cnt1 + 1.0)

    # ------------------- target (graph) branch -------------------
    # target_encoder: dense + ReLU.  TODO(synk): opaque GNN encoder -> dense.
    node_emb = jnp.dot(x2_ref[...], w_g_ref[...], preferred_element_type=f32)
    node_emb = jnp.maximum(node_emb + b_g_ref[...], 0.0)       # (n2_pad, LANE)

    # h_n_2 = node_emb_2[:batch_size]  (aligned sublane slice, lane-dense store)
    bs2_pad = hn2_ref.shape[0]
    hn2_ref[...] = node_emb[:bs2_pad, :]

    # MyReadout over node_emb_2[:-batch_size]; batch ids for the trailing
    # batch nodes / padding rows are -1 so they never contribute.
    n_sub_pad = hsub2_ref.shape[0]
    n2_pad = x2_ref.shape[0]
    rows2 = jax.lax.broadcasted_iota(jnp.int32, (n_sub_pad, n2_pad), 0)
    smask = (bidx_ref[...] == rows2).astype(f32)               # (n_sub_pad, n2_pad)
    sums2 = jnp.dot(smask, node_emb, preferred_element_type=f32)
    cnt2 = jnp.sum(smask, axis=-1, keepdims=True)
    hsub2_ref[...] = sums2 / (cnt2 + 1.0)


def _full_spec(shape):
    return pl.BlockSpec(shape, lambda i: tuple(0 for _ in shape))


@functools.partial(
    jax.jit,
    static_argnames=("node_base", "bs1", "bs2", "n_sub2", "d"))
def _forward_jit(params_p, edge_fea, eidx, nidx, x2, batch2,
                 *, node_base, bs1, bs2, n_sub2, d):
    # ---------------- pad everything to lane/sublane-dense tiles ----------------
    n_edges, _ = edge_fea.shape
    m_inc = eidx.shape[0]
    n2 = x2.shape[0]

    ne_pad = _round_up(n_edges, SUBLANE)
    m_pad = _round_up(m_inc, SUBLANE)
    bs1_pad = _round_up(bs1, SUBLANE)
    bs2_pad = _round_up(bs2, SUBLANE)
    n2_pad = _round_up(n2, SUBLANE)
    n_sub2_pad = _round_up(n_sub2, SUBLANE)
    f_h_pad = params_p["w_enc_h"].shape[0]
    f_g_pad = params_p["w_enc_g"].shape[0]

    edge_fea_p = _pad2(edge_fea, ne_pad, f_h_pad)
    eidx_p = jnp.pad(eidx.astype(jnp.int32), (0, m_pad - m_inc),
                     constant_values=0).reshape(m_pad, 1)
    nidx_p = jnp.pad(nidx.astype(jnp.int32), (0, m_pad - m_inc),
                     constant_values=-1).reshape(1, m_pad)

    x2_p = _pad2(x2, n2_pad, f_g_pad)
    bidx_p = jnp.pad(batch2.astype(jnp.int32), (0, n2_pad - batch2.shape[0]),
                     constant_values=-1).reshape(1, n2_pad)

    # ---------------- single fused pallas_call ----------------
    kernel = functools.partial(_bourne_fused_kernel, node_base=node_base)
    hn1_pad, hn2_pad, hsub2_pad = pl.pallas_call(
        kernel,
        out_shape=(jax.ShapeDtypeStruct((bs1_pad, LANE), jnp.float32),
                   jax.ShapeDtypeStruct((bs2_pad, LANE), jnp.float32),
                   jax.ShapeDtypeStruct((n_sub2_pad, LANE), jnp.float32)),
        grid=(1,),
        in_specs=[
            _full_spec(edge_fea_p.shape),
            _full_spec(params_p["w_enc_h"].shape),
            _full_spec(params_p["b_enc_h"].shape),
            _full_spec(params_p["w_pred"].shape),
            _full_spec(params_p["b_pred"].shape),
            _full_spec(eidx_p.shape),
            _full_spec(nidx_p.shape),
            _full_spec(x2_p.shape),
            _full_spec(params_p["w_enc_g"].shape),
            _full_spec(params_p["b_enc_g"].shape),
            _full_spec(bidx_p.shape),
        ],
        out_specs=(_full_spec((bs1_pad, LANE)),
                   _full_spec((bs2_pad, LANE)),
                   _full_spec((n_sub2_pad, LANE))),
        compiler_params=pltpu.CompilerParams(
            dimension_semantics=("arbitrary",)),
    )(edge_fea_p, params_p["w_enc_h"], params_p["b_enc_h"],
      params_p["w_pred"], params_p["b_pred"], eidx_p, nidx_p,
      x2_p, params_p["w_enc_g"], params_p["b_enc_g"], bidx_p)

    h_n_1 = hn1_pad[:bs1, :d]
    h_n_2 = jax.lax.stop_gradient(hn2_pad[:bs2, :d])
    h_sub_2 = jax.lax.stop_gradient(hsub2_pad[:n_sub2, :d])
    return h_n_1, h_n_2, h_sub_2


# ----------------------------------------------------------------------------
# BOURNE_Edge.forward
# ----------------------------------------------------------------------------
def bourne_edge_forward(params_p, data1, data2, d):
    bs1 = int(data1["batch_size"])
    n_nodes1 = int(data1["n_id"].shape[0]) + bs1
    bs2 = int(data2["batch_size"])
    n_sub2 = int(data2["num_subgraphs"])

    # h_sub_1 / h_n_1_e are computed but never consumed by the reference
    # forward() return value -> removed as dead work.
    return _forward_jit(
        params_p,
        data1["edge_fea"],
        data1["hyper_edge_index"][0],
        data1["hyper_edge_index"][1],
        data2["x"],
        data2["batch"],
        node_base=n_nodes1 - bs1,
        bs1=bs1, bs2=bs2, n_sub2=n_sub2, d=d)


# ----------------------------------------------------------------------------
# Deterministic parameter / input construction
# ----------------------------------------------------------------------------
def make_params(key, f_edge, f_node, d):
    ks = jax.random.split(key, 3)

    def glorot(k, shape):
        lim = (6.0 / (shape[0] + shape[1])) ** 0.5
        return jax.random.uniform(k, shape, jnp.float32, -lim, lim)

    return {
        "w_enc_h": glorot(ks[0], (f_edge, d)),
        "b_enc_h": jnp.zeros((d,), jnp.float32),
        "w_pred":  glorot(ks[1], (d, d)),
        "b_pred":  jnp.zeros((d,), jnp.float32),
        "w_enc_g": glorot(ks[2], (f_node, d)),
        "b_enc_g": jnp.zeros((d,), jnp.float32),
    }


def pad_params(params):
    """Zero-pad weights/biases once, up front, to lane-dense (x, 128) tiles."""
    out = {}
    for wname, bname in (("w_enc_h", "b_enc_h"), ("w_pred", "b_pred"),
                         ("w_enc_g", "b_enc_g")):
        w = params[wname]
        f, dd = w.shape
        out[wname] = _pad2(w, _round_up(f, LANE), _round_up(dd, LANE))
        b = params[bname].reshape(1, -1)
        out[bname] = _pad2(b, 1, _round_up(dd, LANE))
    return out


if __name__ == "__main__":
    key = jax.random.PRNGKey(0)
    k = jax.random.split(key, 6)

    F_EDGE, F_NODE, D = 16, 16, 32
    N_EDGES = 20          # hyper-edges (rows of data1.edge_fea)
    M_INC = 40            # incidences in hyper_edge_index
    N_ID1, BS1 = 24, 8    # data1: sampled nodes + batch nodes -> 32 node slots
    N_SUB1 = 6
    N2, BS2 = 32, 8       # data2 node count / batch size
    N_SUB2 = 6

    params = make_params(k[0], F_EDGE, F_NODE, D)
    params_p = pad_params(params)

    data1 = {
        "edge_fea": jax.random.normal(k[1], (N_EDGES, F_EDGE), jnp.float32),
        "hyper_edge_index": jnp.stack([
            jax.random.randint(k[2], (M_INC,), 0, N_EDGES),      # edge ids
            jax.random.randint(k[3], (M_INC,), 0, N_ID1 + BS1),  # node ids
        ]).astype(jnp.int32),
        "n_id": jnp.arange(N_ID1, dtype=jnp.int32),
        "batch_size": BS1,
        # data1.batch / num_subgraphs feed only the dead h_sub_1 readout.
        "batch": (jnp.arange(N_ID1, dtype=jnp.int32) // (N_ID1 // N_SUB1)),
        "num_subgraphs": N_SUB1,
    }
    data2 = {
        "x": jax.random.normal(k[4], (N2, F_NODE), jnp.float32),
        "edge_index": jax.random.randint(k[5], (2, 48), 0, N2).astype(jnp.int32),
        "batch_size": BS2,
        "batch": (jnp.arange(N2 - BS2, dtype=jnp.int32) // ((N2 - BS2) // N_SUB2)),
        "num_subgraphs": N_SUB2,
    }

    h_n_1, h_n_2, h_sub_2 = bourne_edge_forward(params_p, data1, data2, D)
    jax.block_until_ready((h_n_1, h_n_2, h_sub_2))

    assert h_n_1.shape == (BS1, D)
    assert h_n_2.shape == (BS2, D)
    assert h_sub_2.shape == (N_SUB2, D)
    print("KERNEL_OK")
</pallas_src>

<mosaic_0001>
module attributes {stable_mosaic.version = 11 : i64} {
  func.func @_bourne_fused_kernel(%arg0: i32, %arg1: memref<24x128xf32, #tpu.memory_space<vmem>>, %arg2: memref<128x128xf32, #tpu.memory_space<vmem>>, %arg3: memref<1x128xf32, #tpu.memory_space<vmem>>, %arg4: memref<128x128xf32, #tpu.memory_space<vmem>>, %arg5: memref<1x128xf32, #tpu.memory_space<vmem>>, %arg6: memref<40x1xi32, #tpu.memory_space<vmem>>, %arg7: memref<1x40xi32, #tpu.memory_space<vmem>>, %arg8: memref<32x128xf32, #tpu.memory_space<vmem>>, %arg9: memref<128x128xf32, #tpu.memory_space<vmem>>, %arg10: memref<1x128xf32, #tpu.memory_space<vmem>>, %arg11: memref<1x32xi32, #tpu.memory_space<vmem>>, %arg12: memref<8x128xf32, #tpu.memory_space<vmem>>, %arg13: memref<8x128xf32, #tpu.memory_space<vmem>>, %arg14: memref<8x128xf32, #tpu.memory_space<vmem>>) attributes {dimension_semantics = [#tpu.dimension_semantics<arbitrary>], iteration_bounds = array<i64: 1>, scalar_prefetch = 0 : i64, scratch_operands = 0 : i64, tpu.core_type = #tpu.core_type<tc>, window_params = [{pipeline_mode = #tpu.pipeline_mode<synchronous>, transform_indices = @transform_0, window_bounds = array<i64: 24, 128>}, {pipeline_mode = #tpu.pipeline_mode<synchronous>, transform_indices = @transform_1, window_bounds = array<i64: 128, 128>}, {pipeline_mode = #tpu.pipeline_mode<synchronous>, transform_indices = @transform_2, window_bounds = array<i64: 1, 128>}, {pipeline_mode = #tpu.pipeline_mode<synchronous>, transform_indices = @transform_3, window_bounds = array<i64: 128, 128>}, {pipeline_mode = #tpu.pipeline_mode<synchronous>, transform_indices = @transform_4, window_bounds = array<i64: 1, 128>}, {pipeline_mode = #tpu.pipeline_mode<synchronous>, transform_indices = @transform_5, window_bounds = array<i64: 40, 1>}, {pipeline_mode = #tpu.pipeline_mode<synchronous>, transform_indices = @transform_6, window_bounds = array<i64: 1, 40>}, {pipeline_mode = #tpu.pipeline_mode<synchronous>, transform_indices = @transform_7, window_bounds = array<i64: 32, 128>}, {pipeline_mode = #tpu.pipeline_mode<synchronous>, transform_indices = @transform_8, window_bounds = array<i64: 128, 128>}, {pipeline_mode = #tpu.pipeline_mode<synchronous>, transform_indices = @transform_9, window_bounds = array<i64: 1, 128>}, {pipeline_mode = #tpu.pipeline_mode<synchronous>, transform_indices = @transform_10, window_bounds = array<i64: 1, 32>}, {pipeline_mode = #tpu.pipeline_mode<synchronous>, transform_indices = @transform_11, window_bounds = array<i64: 8, 128>}, {pipeline_mode = #tpu.pipeline_mode<synchronous>, transform_indices = @transform_12, window_bounds = array<i64: 8, 128>}, {pipeline_mode = #tpu.pipeline_mode<synchronous>, transform_indices = @transform_13, window_bounds = array<i64: 8, 128>}]} {
    %c0 = arith.constant 0 : index
    %c0_0 = arith.constant 0 : index
    %0 = vector.load %arg1[%c0, %c0_0] : memref<24x128xf32, #tpu.memory_space<vmem>>, vector<24x128xf32>
    %c0_1 = arith.constant 0 : index
    %c0_2 = arith.constant 0 : index
    %1 = vector.load %arg2[%c0_1, %c0_2] : memref<128x128xf32, #tpu.memory_space<vmem>>, vector<128x128xf32>
    %cst = arith.constant dense<0.000000e+00> : vector<24x128xf32>
    %2 = tpu.matmul %0, %1, %cst {dimension_numbers = #tpu.dot_dimension_numbers<[1], [0], [0], [1], [0, 0, 1, 1], [], []>} : vector<24x128xf32>, vector<128x128xf32>, vector<24x128xf32> -> vector<24x128xf32>
    %c0_3 = arith.constant 0 : index
    %c0_4 = arith.constant 0 : index
    %3 = vector.load %arg3[%c0_3, %c0_4] : memref<1x128xf32, #tpu.memory_space<vmem>>, vector<1x128xf32>
    %4 = vector.broadcast %3 : vector<1x128xf32> to vector<24x128xf32>
    %5 = arith.addf %2, %4 : vector<24x128xf32>
    %cst_5 = arith.constant 0.000000e+00 : f32
    %6 = vector.broadcast %cst_5 : f32 to vector<24x128xf32>
    %7 = arith.maximumf %5, %6 : vector<24x128xf32>
    %c0_6 = arith.constant 0 : index
    %c0_7 = arith.constant 0 : index
    %8 = vector.load %arg4[%c0_6, %c0_7] : memref<128x128xf32, #tpu.memory_space<vmem>>, vector<128x128xf32>
    %cst_8 = arith.constant dense<0.000000e+00> : vector<24x128xf32>
    %9 = tpu.matmul %7, %8, %cst_8 {dimension_numbers = #tpu.dot_dimension_numbers<[1], [0], [0], [1], [0, 0, 1, 1], [], []>} : vector<24x128xf32>, vector<128x128xf32>, vector<24x128xf32> -> vector<24x128xf32>
    %c0_9 = arith.constant 0 : index
    %c0_10 = arith.constant 0 : index
    %10 = vector.load %arg5[%c0_9, %c0_10] : memref<1x128xf32, #tpu.memory_space<vmem>>, vector<1x128xf32>
    %11 = vector.broadcast %10 : vector<1x128xf32> to vector<24x128xf32>
    %12 = arith.addf %9, %11 : vector<24x128xf32>
    %13 = tpu.iota {dimensions = array<i32: 1>} : vector<40x24xi32>
    %c0_11 = arith.constant 0 : index
    %c0_12 = arith.constant 0 : index
    %14 = vector.load %arg6[%c0_11, %c0_12] : memref<40x1xi32, #tpu.memory_space<vmem>>, vector<40x1xi32>
    %15 = vector.broadcast %14 : vector<40x1xi32> to vector<40x24xi32>
    %16 = arith.cmpi eq, %15, %13 : vector<40x24xi32>
    %17 = arith.extui %16 : vector<40x24xi1> to vector<40x24xi32>
    %18 = arith.sitofp %17 : vector<40x24xi32> to vector<40x24xf32>
    %cst_13 = arith.constant dense<0.000000e+00> : vector<40x128xf32>
    %19 = tpu.matmul %18, %12, %cst_13 {dimension_numbers = #tpu.dot_dimension_numbers<[1], [0], [0], [1], [0, 0, 1, 1], [], []>} : vector<40x24xf32>, vector<24x128xf32>, vector<40x128xf32> -> vector<40x128xf32>
    %20 = tpu.iota {dimensions = array<i32: 0>} : vector<8x40xi32>
    %c24_i32 = arith.constant 24 : i32
    %21 = vector.broadcast %c24_i32 : i32 to vector<8x40xi32>
    %22 = arith.addi %20, %21 : vector<8x40xi32>
    %c0_14 = arith.constant 0 : index
    %c0_15 = arith.constant 0 : index
    %23 = vector.load %arg7[%c0_14, %c0_15] : memref<1x40xi32, #tpu.memory_space<vmem>>, vector<1x40xi32>
    %24 = vector.broadcast %23 : vector<1x40xi32> to vector<8x40xi32>
    %25 = arith.cmpi eq, %24, %22 : vector<8x40xi32>
    %26 = arith.extui %25 : vector<8x40xi1> to vector<8x40xi32>
    %27 = arith.sitofp %26 : vector<8x40xi32> to vector<8x40xf32>
    %cst_16 = arith.constant dense<0.000000e+00> : vector<8x128xf32>
    %28 = tpu.matmul %27, %19, %cst_16 {dimension_numbers = #tpu.dot_dimension_numbers<[1], [0], [0], [1], [0, 0, 1, 1], [], []>} : vector<8x40xf32>, vector<40x128xf32>, vector<8x128xf32> -> vector<8x128xf32>
    %cst_17 = arith.constant dense<0.000000e+00> : vector<8xf32>
    %29 = vector.multi_reduction <add>, %27, %cst_17 [1] : vector<8x40xf32> to vector<8xf32>
    %30 = vector.shape_cast %29 : vector<8xf32> to vector<8x1xf32>
    %cst_18 = arith.constant 1.000000e+00 : f32
    %31 = vector.broadcast %cst_18 : f32 to vector<8x1xf32>
    %32 = arith.addf %30, %31 : vector<8x1xf32>
    %33 = vector.broadcast %32 : vector<8x1xf32> to vector<8x128xf32>
    %34 = arith.divf %28, %33 : vector<8x128xf32>
    %c0_19 = arith.constant 0 : index
    %c0_20 = arith.constant 0 : index
    %35 = vector.load %arg12[%c0_19, %c0_20] : memref<8x128xf32, #tpu.memory_space<vmem>>, vector<8x128xf32>
    tpu.vector_store %arg12[%c0_19, %c0_20], %34 {strides = array<i32>} : memref<8x128xf32, #tpu.memory_space<vmem>>, vector<8x128xf32>,
    %c0_21 = arith.constant 0 : index
    %c0_22 = arith.constant 0 : index
    %36 = vector.load %arg8[%c0_21, %c0_22] : memref<32x128xf32, #tpu.memory_space<vmem>>, vector<32x128xf32>
    %c0_23 = arith.constant 0 : index
    %c0_24 = arith.constant 0 : index
    %37 = vector.load %arg9[%c0_23, %c0_24] : memref<128x128xf32, #tpu.memory_space<vmem>>, vector<128x128xf32>
    %cst_25 = arith.constant dense<0.000000e+00> : vector<32x128xf32>
    %38 = tpu.matmul %36, %37, %cst_25 {dimension_numbers = #tpu.dot_dimension_numbers<[1], [0], [0], [1], [0, 0, 1, 1], [], []>} : vector<32x128xf32>, vector<128x128xf32>, vector<32x128xf32> -> vector<32x128xf32>
    %c0_26 = arith.constant 0 : index
    %c0_27 = arith.constant 0 : index
    %39 = vector.load %arg10[%c0_26, %c0_27] : memref<1x128xf32, #tpu.memory_space<vmem>>, vector<1x128xf32>
    %40 = vector.broadcast %39 : vector<1x128xf32> to vector<32x128xf32>
    %41 = arith.addf %38, %40 : vector<32x128xf32>
    %cst_28 = arith.constant 0.000000e+00 : f32
    %42 = vector.broadcast %cst_28 : f32 to vector<32x128xf32>
    %43 = arith.maximumf %41, %42 : vector<32x128xf32>
    %44 = vector.extract_strided_slice %43 {offsets = [0, 0], sizes = [8, 128], strides = [1, 1]} : vector<32x128xf32> to vector<8x128xf32>
    %c0_29 = arith.constant 0 : index
    %c0_30 = arith.constant 0 : index
    %45 = vector.load %arg13[%c0_29, %c0_30] : memref<8x128xf32, #tpu.memory_space<vmem>>, vector<8x128xf32>
    tpu.vector_store %arg13[%c0_29, %c0_30], %44 {strides = array<i32>} : memref<8x128xf32, #tpu.memory_space<vmem>>, vector<8x128xf32>,
    %46 = tpu.iota {dimensions = array<i32: 0>} : vector<8x32xi32>
    %c0_31 = arith.constant 0 : index
    %c0_32 = arith.constant 0 : index
    %47 = vector.load %arg11[%c0_31, %c0_32] : memref<1x32xi32, #tpu.memory_space<vmem>>, vector<1x32xi32>
    %48 = vector.broadcast %47 : vector<1x32xi32> to vector<8x32xi32>
    %49 = arith.cmpi eq, %48, %46 : vector<8x32xi32>
    %50 = arith.extui %49 : vector<8x32xi1> to vector<8x32xi32>
    %51 = arith.sitofp %50 : vector<8x32xi32> to vector<8x32xf32>
    %cst_33 = arith.constant dense<0.000000e+00> : vector<8x128xf32>
    %52 = tpu.matmul %51, %43, %cst_33 {dimension_numbers = #tpu.dot_dimension_numbers<[1], [0], [0], [1], [0, 0, 1, 1], [], []>} : vector<8x32xf32>, vector<32x128xf32>, vector<8x128xf32> -> vector<8x128xf32>
    %cst_34 = arith.constant dense<0.000000e+00> : vector<8xf32>
    %53 = vector.multi_reduction <add>, %51, %cst_34 [1] : vector<8x32xf32> to vector<8xf32>
    %54 = vector.shape_cast %53 : vector<8xf32> to vector<8x1xf32>
    %cst_35 = arith.constant 1.000000e+00 : f32
    %55 = vector.broadcast %cst_35 : f32 to vector<8x1xf32>
    %56 = arith.addf %54, %55 : vector<8x1xf32>
    %57 = vector.broadcast %56 : vector<8x1xf32> to vector<8x128xf32>
    %58 = arith.divf %52, %57 : vector<8x128xf32>
    %c0_36 = arith.constant 0 : index
    %c0_37 = arith.constant 0 : index
    %59 = vector.load %arg14[%c0_36, %c0_37] : memref<8x128xf32, #tpu.memory_space<vmem>>, vector<8x128xf32>
    tpu.vector_store %arg14[%c0_36, %c0_37], %58 {strides = array<i32>} : memref<8x128xf32, #tpu.memory_space<vmem>>, vector<8x128xf32>,
    return
  }
  func.func @transform_0(%arg0: i32) -> (i32, i32) {
    %c0_i32 = arith.constant 0 : i32
    %c0_i32_0 = arith.constant 0 : i32
    %c0_i32_1 = arith.constant 0 : i32
    return %c0_i32, %c0_i32_0 : i32, i32
  }
  func.func @transform_1(%arg0: i32) -> (i32, i32) {
    %c0_i32 = arith.constant 0 : i32
    %c0_i32_0 = arith.constant 0 : i32
    %c0_i32_1 = arith.constant 0 : i32
    return %c0_i32, %c0_i32_0 : i32, i32
  }
  func.func @transform_2(%arg0: i32) -> (i32, i32) {
    %c0_i32 = arith.constant 0 : i32
    %c0_i32_0 = arith.constant 0 : i32
    %c0_i32_1 = arith.constant 0 : i32
    return %c0_i32, %c0_i32_0 : i32, i32
  }
  func.func @transform_3(%arg0: i32) -> (i32, i32) {
    %c0_i32 = arith.constant 0 : i32
    %c0_i32_0 = arith.constant 0 : i32
    %c0_i32_1 = arith.constant 0 : i32
    return %c0_i32, %c0_i32_0 : i32, i32
  }
  func.func @transform_4(%arg0: i32) -> (i32, i32) {
    %c0_i32 = arith.constant 0 : i32
    %c0_i32_0 = arith.constant 0 : i32
    %c0_i32_1 = arith.constant 0 : i32
    return %c0_i32, %c0_i32_0 : i32, i32
  }
  func.func @transform_5(%arg0: i32) -> (i32, i32) {
    %c0_i32 = arith.constant 0 : i32
    %c0_i32_0 = arith.constant 0 : i32
    %c0_i32_1 = arith.constant 0 : i32
    return %c0_i32, %c0_i32_0 : i32, i32
  }
  func.func @transform_6(%arg0: i32) -> (i32, i32) {
    %c0_i32 = arith.constant 0 : i32
    %c0_i32_0 = arith.constant 0 : i32
    %c0_i32_1 = arith.constant 0 : i32
    return %c0_i32, %c0_i32_0 : i32, i32
  }
  func.func @transform_7(%arg0: i32) -> (i32, i32) {
    %c0_i32 = arith.constant 0 : i32
    %c0_i32_0 = arith.constant 0 : i32
    %c0_i32_1 = arith.constant 0 : i32
    return %c0_i32, %c0_i32_0 : i32, i32
  }
  func.func @transform_8(%arg0: i32) -> (i32, i32) {
    %c0_i32 = arith.constant 0 : i32
    %c0_i32_0 = arith.constant 0 : i32
    %c0_i32_1 = arith.constant 0 : i32
    return %c0_i32, %c0_i32_0 : i32, i32
  }
  func.func @transform_9(%arg0: i32) -> (i32, i32) {
    %c0_i32 = arith.constant 0 : i32
    %c0_i32_0 = arith.constant 0 : i32
    %c0_i32_1 = arith.constant 0 : i32
    return %c0_i32, %c0_i32_0 : i32, i32
  }
  func.func @transform_10(%arg0: i32) -> (i32, i32) {
    %c0_i32 = arith.constant 0 : i32
    %c0_i32_0 = arith.constant 0 : i32
    %c0_i32_1 = arith.constant 0 : i32
    return %c0_i32, %c0_i32_0 : i32, i32
  }
  func.func @transform_11(%arg0: i32) -> (i32, i32) {
    %c0_i32 = arith.constant 0 : i32
    %c0_i32_0 = arith.constant 0 : i32
    %c0_i32_1 = arith.constant 0 : i32
    return %c0_i32, %c0_i32_0 : i32, i32
  }
  func.func @transform_12(%arg0: i32) -> (i32, i32) {
    %c0_i32 = arith.constant 0 : i32
    %c0_i32_0 = arith.constant 0 : i32
    %c0_i32_1 = arith.constant 0 : i32
    return %c0_i32, %c0_i32_0 : i32, i32
  }
  func.func @transform_13(%arg0: i32) -> (i32, i32) {
    %c0_i32 = arith.constant 0 : i32
    %c0_i32_0 = arith.constant 0 : i32
    %c0_i32_1 = arith.constant 0 : i32
    return %c0_i32, %c0_i32_0 : i32, i32
  }
}

</mosaic_0001>

<bundles_post_ra>
// kernel: _forward_jit.1
= control target key start
LH: loop header
LB: loop body
LE: loop exit
PB: predicated region body
PF: predicated region fallthrough
CT: control target
= control target key end

     0   :  { %19 = vsyncpa [#allocation3], 0  ;;  %s1545_s0 = inlined_call_operand.vmem [shape: f32[24,128], index: 0, kind: input, shape index: {}]   ;;  %s1546_s1 = inlined_call_operand.vmem [shape: f32[128,128], index: 1, kind: input, shape index: {}]   ;;  %s1547_s2 = inlined_call_operand.hbm [shape: f32[1,128], index: 2, kind: input, shape index: {}]   ;;  %s1548_s3 = inlined_call_operand.vmem [shape: f32[128,128], index: 3, kind: input, shape index: {}]   ;;  %s1549_s4 = inlined_call_operand.hbm [shape: f32[1,128], index: 4, kind: input, shape index: {}]   ;;  %s1550_s5 = inlined_call_operand.vmem [shape: s32[40,1], index: 5, kind: input, shape index: {}]   ;;  %s1551_s6 = inlined_call_operand.vmem [shape: s32[1,40], index: 6, kind: input, shape index: {}]   ;;  %s1552_s7 = inlined_call_operand.vmem [shape: f32[32,128], index: 7, kind: input, shape index: {}]   ;;  %s1553_s8 = inlined_call_operand.hbm [shape: f32[128,128], index: 8, kind: input, shape index: {}]   ;;  %s1554_s9 = inlined_call_operand.hbm [shape: f32[1,128], index: 9, kind: input, shape index: {}]   ;;  %s1555_s10 = inlined_call_operand.vmem [shape: s32[1,32], index: 10, kind: input, shape index: {}]   ;;  %s1556_s11 = inlined_call_operand.hbm [shape: f32[8,128], index: 11, kind: output, shape index: {0}]   ;;  %s1557_s12 = inlined_call_operand.hbm [shape: f32[8,128], index: 12, kind: output, shape index: {1}]   ;;  %s1558_s13 = inlined_call_operand.hbm [shape: f32[8,128], index: 13, kind: output, shape index: {2}]  }
   0x1   :  { %20 = vsyncpa [#allocation6], 0 }
   0x2   :  { %21 = vsyncpa [#allocation9], 0 }
   0x3   :  { %22 = vsyncpa [#allocation4], 0 }
   0x4   :  { %23 = vsyncpa [#allocation12], 0  ;;  %s1218_s25 = smov [#allocation5]   ;;  %s1219_s27 = smov [#allocation2]  }
   0x5   :  { %s46_s26 = sshll.u32 %s1218_s25, 4  ;;  %s34_s28 = sshll.u32 %s1219_s27, 4  ;;  %s47_s26 = int_to_ptr.vmem [resolvable:$true] %s46_s26  ;;  %s35_s28 = int_to_ptr.vmem [resolvable:$true] %s34_s28 }
   0x6   :  { %s1076_s29 = scalar_lea.vmem %s47_s26, 16  ;;  %s1080_s30 = scalar_lea.vmem %s47_s26, 32 }
   0x7   :  { %p1077_p0 = scmp.ne.s32.totalorder %s47_s26, %s1076_s29  ;;  %p1081_p1 = scmp.lt.s32.totalorder %s47_s26, %s47_s26 }
   0x8   :  { %p1082_p2 = scmp.lt.s32.totalorder %s1080_s30, %s1076_s29 }
   0xa   :  { %p1083_p3 = por %p1082_p2, %p1081_p1 }
   0xc   :  { %p1084_p4 = pnand %p1083_p3, %p1077_p0 }
   0xe   :  { %1087 = shalt.err (!%p1084_p4)
}
   0xf   :  { %49 = dma.hbm_to_vmem [thread:$0]  %s1549_s4, 16, %s47_s26, [#allocation6]  }
  0x10   :  { %s1096_s16 = scalar_lea.vmem %s35_s28, 16  ;;  %s1100_s17 = scalar_lea.vmem %s35_s28, 32 }
  0x11   :  { %p1097_p5 = scmp.ne.s32.totalorder %s35_s28, %s1096_s16  ;;  %p1101_p6 = scmp.lt.s32.totalorder %s35_s28, %s35_s28 }
  0x12   :  { %p1102_p7 = scmp.lt.s32.totalorder %s1100_s17, %s1096_s16 }
  0x14   :  { %p1103_p8 = por %p1102_p7, %p1101_p6 }
  0x16   :  { %p1104_p9 = pnand %p1103_p8, %p1097_p5 }
  0x18   :  { %1107 = shalt.err (!%p1104_p9)
}
  0x19   :  { %37 = dma.hbm_to_vmem [thread:$0]  %s1547_s2, 16, %s35_s28, [#allocation3]  }
  0x1a   :  { %s1220_s20 = smov [#allocation7]  }
  0x1b   :  { %s61_s21 = sshll.u32 %s1220_s20, 4  ;;  %s62_s21 = int_to_ptr.vmem [resolvable:$true] %s61_s21 }
  0x1c   :  { %s1116_s22 = scalar_lea.vmem %s62_s21, 2048  ;;  %p1121_p11 = scmp.lt.s32.totalorder %s62_s21, %s62_s21 }
  0x1d   :  { %p1117_p10 = scmp.ne.s32.totalorder %s62_s21, %s1116_s22  ;;  %p1122_p12 = scmp.lt.s32.totalorder %s1116_s22, %s1116_s22 }
  0x1f   :  { %p1123_p13 = por %p1122_p12, %p1121_p11 }
  0x21   :  { %p1124_p0 = pnand %p1123_p13, %p1117_p10 }
  0x23   :  { %1127 = shalt.err (!%p1124_p0)
}
  0x24   :  { %s1221_s4 = smov 128   ;;  %s1222_s23 = smov 8  }
  0x25   :  { %67 = dma.hbm_to_vmem [thread:$0]  %s1553_s8, 2048, %s62_s21, [#allocation6], %s1221_s4, %s1221_s4, %s1222_s23  }
  0x26   :  { %s1223_s26 = smov [#allocation8]  }
  0x27   :  { %s74_s27 = sshll.u32 %s1223_s26, 4  ;;  %s75_s27 = int_to_ptr.vmem [resolvable:$true] %s74_s27 }
  0x28   :  { %s1136_s2 = scalar_lea.vmem %s75_s27, 16  ;;  %s1140_s28 = scalar_lea.vmem %s75_s27, 32 }
  0x29   :  { %p1137_p1 = scmp.ne.s32.totalorder %s75_s27, %s1136_s2  ;;  %p1141_p2 = scmp.lt.s32.totalorder %s75_s27, %s75_s27 }
  0x2a   :  { %p1142_p3 = scmp.lt.s32.totalorder %s1140_s28, %s1136_s2 }
  0x2c   :  { %p1143_p4 = por %p1142_p3, %p1141_p2 }
  0x2e   :  { %p1144_p5 = pnand %p1143_p4, %p1137_p1 }
  0x30   :  { %1147 = shalt.err (!%p1144_p5)
}
  0x31   :  { %77 = dma.hbm_to_vmem [thread:$0]  %s1554_s9, 16, %s75_s27, [#allocation9]  }
  0x32   :  { %1208 = dma.done.wait [#allocation3], 16  }
  0x33   :  { %1209 = vsyncadd [#allocation3], 4294967280 }
  0x34   :  { %1210 = dma.done.wait [#allocation6], 2064  }
  0x35   :  { %1211 = vsyncadd [#allocation6], 4294965232 }
  0x36   :  { %1212 = dma.done.wait [#allocation9], 16  }
  0x37   :  { %1213 = vsyncadd [#allocation9], 4294967280  ;;  %v1224_v0 = vmov 0.0   ;;  %vm1225_vm0 = vmmov 0   ;;  %v110_v1 = vld [vmem:[%s1546_s1 + $0x78] sm:$0xff]  ;;  %v109_v2 = vld [vmem:[%s1546_s1 + $0x70] sm:$0xff] }
  0x38   :  { %885 = vmatprep.subr.mxu0 %v1224_v0  ;;  %917 = vmatprep.mubr.msk.f32.mxu0 %vm1225_vm0, %v1224_v0  ;;  %v108_v3 = vld [vmem:[%s1546_s1 + $0x68] sm:$0xff]  ;;  %v107_v4 = vld [vmem:[%s1546_s1 + $0x60] sm:$0xff]  ;;  %v106_v5 = vld [vmem:[%s1546_s1 + $0x58] sm:$0xff]  ;;  %v1226_v37 = vmov 0   ;;  %vm341_vm2 = vcmask 195584   ;;  %vm458_vm9 = vcmask 326656  }
  0x39   :  { %926 = vmatprep.subr.mxu1 %v1224_v0  ;;  %958 = vmatprep.mubr.msk.f32.mxu1 %vm1225_vm0, %v1224_v0  ;;  %v216_v6 = vld [vmem:[%s1548_s3 + $0x78] sm:$0xff]  ;;  %v215_v7 = vld [vmem:[%s1548_s3 + $0x70] sm:$0xff]  ;;  %v214_v9 = vld [vmem:[%s1548_s3 + $0x68] sm:$0xff]  ;;  %vm664_vm10 = vcmask 261120  }
  0x3a   :  { %886 = vmatpush3.msra.mxu0 %v110_v1  ;;  %927 = vmatpush3.msra.mxu1 %v216_v6  ;;  %v105_v8 = vld [vmem:[%s1546_s1 + $0x50] sm:$0xff]  ;;  %v104_v10 = vld [vmem:[%s1546_s1 + $0x48] sm:$0xff]  ;;  %v213_v11 = vld [vmem:[%s1548_s3 + $0x60] sm:$0xff] }
  0x3b   :  { %887 = vmatprep.subr.mxu0 %v1224_v0  ;;  %928 = vmatprep.subr.mxu1 %v1224_v0  ;;  %v103_v12 = vld [vmem:[%s1546_s1 + $0x40] sm:$0xff]  ;;  %v212_v13 = vld [vmem:[%s1548_s3 + $0x58] sm:$0xff]  ;;  %v211_v15 = vld [vmem:[%s1548_s3 + $0x50] sm:$0xff] }
  0x3c   :  { %888 = vmatpush3.msra.mxu0 %v109_v2  ;;  %929 = vmatpush3.msra.mxu1 %v215_v7  ;;  %v102_v14 = vld [vmem:[%s1546_s1 + $0x38] sm:$0xff]  ;;  %v101_v16 = vld [vmem:[%s1546_s1 + $0x30] sm:$0xff]  ;;  %v210_v17 = vld [vmem:[%s1548_s3 + $0x48] sm:$0xff] }
  0x3d   :  { %889 = vmatprep.subr.mxu0 %v1224_v0  ;;  %930 = vmatprep.subr.mxu1 %v1224_v0  ;;  %v100_v18 = vld [vmem:[%s1546_s1 + $0x28] sm:$0xff]  ;;  %v209_v19 = vld [vmem:[%s1548_s3 + $0x40] sm:$0xff]  ;;  %v208_v21 = vld [vmem:[%s1548_s3 + $0x38] sm:$0xff] }
  0x3e   :  { %890 = vmatpush3.msra.mxu0 %v108_v3  ;;  %931 = vmatpush3.msra.mxu1 %v214_v9  ;;  %v99_v20 = vld [vmem:[%s1546_s1 + $0x20] sm:$0xff]  ;;  %v98_v22 = vld [vmem:[%s1546_s1 + $0x18] sm:$0xff]  ;;  %v207_v23 = vld [vmem:[%s1548_s3 + $0x30] sm:$0xff] }
  0x3f   :  { %891 = vmatprep.subr.mxu0 %v1224_v0  ;;  %932 = vmatprep.subr.mxu1 %v1224_v0  ;;  %v97_v24 = vld [vmem:[%s1546_s1 + $0x10] sm:$0xff]  ;;  %v206_v25 = vld [vmem:[%s1548_s3 + $0x28] sm:$0xff]  ;;  %v205_v27 = vld [vmem:[%s1548_s3 + $0x20] sm:$0xff] }
  0x40   :  { %892 = vmatpush3.msra.mxu0 %v107_v4  ;;  %933 = vmatpush3.msra.mxu1 %v213_v11  ;;  %v96_v26 = vld [vmem:[%s1546_s1 + $0x8] sm:$0xff]  ;;  %v95_v28 = vld [vmem:[%s1546_s1] sm:$0xff]  ;;  %v204_v29 = vld [vmem:[%s1548_s3 + $0x18] sm:$0xff] }
  0x41   :  { %893 = vmatprep.subr.mxu0 %v1224_v0  ;;  %934 = vmatprep.subr.mxu1 %v1224_v0  ;;  %v92_v30 = vld [vmem:[%s1545_s0] sm:$0xff]  ;;  %v93_v31 = vld [vmem:[%s1545_s0 + $0x8] sm:$0xff]  ;;  %v94_v32 = vld [vmem:[%s1545_s0 + $0x10] sm:$0xff] }
  0x42   :  { %894 = vmatpush3.msra.mxu0 %v106_v5  ;;  %935 = vmatpush3.msra.mxu1 %v212_v13  ;;  %v203_v33 = vld [vmem:[%s1548_s3 + $0x10] sm:$0xff]  ;;  %v202_v34 = vld [vmem:[%s1548_s3 + $0x8] sm:$0xff]  ;;  %v201_v35 = vld [vmem:[%s1548_s3] sm:$0xff] }
  0x43   :  { %895 = vmatprep.subr.mxu0 %v1224_v0  ;;  %936 = vmatprep.subr.mxu1 %v1224_v0  ;;  %v306_v36 = vld [vmem:[%s1550_s5] sm:$0xff]  ;;  %v308_v38 = vld [vmem:[%s1550_s5 + $0x10] sm:$0xff]  ;;  %v307_v39 = vld [vmem:[%s1550_s5 + $0x8] sm:$0xff] }
  0x44   :  { %896 = vmatpush3.msra.mxu0 %v105_v8  ;;  %937 = vmatpush3.msra.mxu1 %v211_v15  ;;  %v309_v40 = vld [vmem:[%s1550_s5 + $0x18] sm:$0xff]  ;;  %v310_v41 = vld [vmem:[%s1550_s5 + $0x20] sm:$0xff]  ;;  %v556_v57 = vld [vmem:[#allocation7 + $0x68] sm:$0xff] }
  0x45   :  { %897 = vmatprep.subr.mxu0 %v1224_v0  ;;  %938 = vmatprep.subr.mxu1 %v1224_v0  ;;  %v789_v42 = vld [vmem:[#allocation2] ss:$0 sm:$0xff]  ;;  %v557_v56 = vld [vmem:[#allocation7 + $0x70] sm:$0xff]  ;;  %v555_v58 = vld [vmem:[#allocation7 + $0x60] sm:$0xff] }
  0x46   :  { %898 = vmatpush3.msra.mxu0 %v104_v10  ;;  %939 = vmatpush3.msra.mxu1 %v210_v17  ;;  %v558_v55 = vld [vmem:[#allocation7 + $0x78] sm:$0xff]  ;;  %v553_v60 = vld [vmem:[#allocation7 + $0x50] sm:$0xff]  ;;  %v552_v61 = vld [vmem:[#allocation7 + $0x48] sm:$0xff] }
  0x47   :  { %899 = vmatprep.subr.mxu0 %v1224_v0  ;;  %940 = vmatprep.subr.mxu1 %v1224_v0  ;;  %v554_v59 = vld [vmem:[#allocation7 + $0x58] sm:$0xff]  ;;  %v551_v62 = vld [vmem:[#allocation7 + $0x40] sm:$0xff]  ;;  %v549_v1 = vld [vmem:[#allocation7 + $0x30] sm:$0xff] }
  0x48   :  { %900 = vmatpush3.msra.mxu0 %v103_v12  ;;  %941 = vmatpush3.msra.mxu1 %v209_v19  ;;  %v550_v63 = vld [vmem:[#allocation7 + $0x38] sm:$0xff]  ;;  %v548_v2 = vld [vmem:[#allocation7 + $0x28] sm:$0xff]  ;;  %v547_v3 = vld [vmem:[#allocation7 + $0x20] sm:$0xff] }
  0x49   :  { %901 = vmatprep.subr.mxu0 %v1224_v0  ;;  %942 = vmatprep.subr.mxu1 %v1224_v0  ;;  %v546_v4 = vld [vmem:[#allocation7 + $0x18] sm:$0xff]  ;;  %v545_v5 = vld [vmem:[#allocation7 + $0x10] sm:$0xff]  ;;  %v544_v6 = vld [vmem:[#allocation7 + $0x8] sm:$0xff] }
  0x4a   :  { %902 = vmatpush3.msra.mxu0 %v102_v14  ;;  %943 = vmatpush3.msra.mxu1 %v208_v21  ;;  %v543_v7 = vld [vmem:[#allocation7] sm:$0xff]  ;;  %v541_v10 = vld [vmem:[%s1552_s7 + $0x10] sm:$0xff]  ;;  %v542_v11 = vld [vmem:[%s1552_s7 + $0x18] sm:$0xff]  ;;  %v304_v14 = vlaneseq }
  0x4b   :  { %903 = vmatprep.subr.mxu0 %v1224_v0  ;;  %944 = vmatprep.subr.mxu1 %v1224_v0  ;;  %v539_v8 = vld [vmem:[%s1552_s7] sm:$0xff]  ;;  %v540_v9 = vld [vmem:[%s1552_s7 + $0x8] sm:$0xff] }
  0x4c   :  { %904 = vmatpush3.msra.mxu0 %v101_v16  ;;  %945 = vmatpush3.msra.mxu1 %v207_v23  ;;  %v305_v16 = vand.u32 127, %v304_v14 }
  0x4d   :  { %905 = vmatprep.subr.mxu0 %v1224_v0  ;;  %946 = vmatprep.subr.mxu1 %v1224_v0 }
  0x4e   :  { %906 = vmatpush3.msra.mxu0 %v100_v18  ;;  %947 = vmatpush3.msra.mxu1 %v206_v25  ;;  %v790_v18 = vld [vmem:[#allocation5] ss:$0 sm:$0xff] }
  0x4f   :  { %907 = vmatprep.subr.mxu0 %v1224_v0  ;;  %948 = vmatprep.subr.mxu1 %v1224_v0 }
  0x50   :  { %908 = vmatpush3.msra.mxu0 %v99_v20  ;;  %949 = vmatpush3.msra.mxu1 %v205_v27 }
  0x51   :  { %909 = vmatprep.subr.mxu0 %v1224_v0  ;;  %950 = vmatprep.subr.mxu1 %v1224_v0 }
  0x52   :  { %910 = vmatpush3.msra.mxu0 %v98_v22  ;;  %951 = vmatpush3.msra.mxu1 %v204_v29 }
  0x53   :  { %911 = vmatprep.subr.mxu0 %v1224_v0  ;;  %952 = vmatprep.subr.mxu1 %v1224_v0 }
  0x54   :  { %912 = vmatpush3.msra.mxu0 %v97_v24  ;;  %953 = vmatpush3.msra.mxu1 %v203_v33 }
  0x55   :  { %913 = vmatprep.subr.mxu0 %v1224_v0  ;;  %954 = vmatprep.subr.mxu1 %v1224_v0 }
  0x56   :  { %914 = vmatpush3.msra.mxu0 %v96_v26  ;;  %955 = vmatpush3.msra.mxu1 %v202_v34 }
  0x57   :  { %915 = vmatprep.subr.mxu0 %v1224_v0  ;;  %956 = vmatprep.subr.mxu1 %v1224_v0 }
  0x58   :  { %916 = vmatpush3.msra.mxu0 %v95_v28  ;;  %957 = vmatpush3.msra.mxu1 %v201_v35  ;;  %v804_v35 = vld [vmem:[#allocation8] ss:$0 sm:$0xff] }
  0x59   :  { %918 = vmatmul.mubr.f32.vlgmr.msra.gmra.mxu0 %v92_v30  ;;  %967 = vmatprep.subr.mxu1 %v1224_v0 }
  0x5a   :  { %920 = vmatprep.mubr.msk.f32.mxu0 %vm1225_vm0, %v1224_v0  ;;  %1062 = vset.pattern.permute.xlu0 %v1226_v37 }
  0x5b   :  { %1063 = vset.pattern.permute.xlu1 %v1226_v37  ;;  %312 = vperm.xlu0 %1062, %v306_v36  }
  0x5c   :  { %318 = vperm.xlu1 %1063, %v308_v38   ;;  %1001 = vmatprep.subr.mxu0 %v558_v55 }
  0x5d   :  { %921 = vmatmul.mubr.f32.gmra.mxu0 %v93_v31 }
  0x5e   :  { %923 = vmatprep.mubr.msk.f32.mxu0 %vm1225_vm0, %v1224_v0  ;;  %1002 = vmatpush3.msra.mxu0 %v558_v55 }
  0x5f   :  { %315 = vperm.xlu0 %1062, %v307_v39   ;;  %1003 = vmatprep.subr.mxu0 %v557_v56 }
  0x60   :  { %321 = vperm.xlu1 %1063, %v309_v40   ;;  %1004 = vmatpush3.msra.mxu0 %v557_v56  ;;  %v448_v40 = vshrl.u32 %v304_v14, 7 }
  0x61   :  { %924 = vmatmul.mubr.f32.gmra.mxu0 %v94_v32  ;;  %1005 = vmatprep.subr.mxu0 %v556_v57 }
  0x62   :  { %1006 = vmatpush3.msra.mxu0 %v556_v57  ;;  %1033 = vmatprep.mubr.f32.mxu0 %v539_v8 }
  0x63   :  { %324 = vperm.xlu0 %1062, %v310_v41   ;;  %1007 = vmatprep.subr.mxu0 %v555_v58  ;;  %v449_v41 = vadd.s32 24, %v448_v40 }
  0x64   :  { %1008 = vmatpush3.msra.mxu0 %v555_v58 }
  0x65   :  { %1009 = vmatprep.subr.mxu0 %v554_v59 }
  0x66   :  { %1010 = vmatpush3.msra.mxu0 %v554_v59 }
  0x67   :  { %1011 = vmatprep.subr.mxu0 %v553_v60 }
  0x68   :  { %1012 = vmatpush3.msra.mxu0 %v553_v60 }
  0x69   :  { %1013 = vmatprep.subr.mxu0 %v552_v61 }
  0x6a   :  { %1014 = vmatpush3.msra.mxu0 %v552_v61 }
  0x6b   :  { %1015 = vmatprep.subr.mxu0 %v551_v62 }
  0x6c   :  { %1016 = vmatpush3.msra.mxu0 %v551_v62 }
  0x6d   :  { %1017 = vmatprep.subr.mxu0 %v550_v63 }
  0x6e   :  { %1018 = vmatpush3.msra.mxu0 %v550_v63 }
  0x6f   :  { %1019 = vmatprep.subr.mxu0 %v549_v1 }
  0x70   :  { %1020 = vmatpush3.msra.mxu0 %v549_v1 }
  0x71   :  { %1021 = vmatprep.subr.mxu0 %v548_v2 }
  0x72   :  { %1022 = vmatpush3.msra.mxu0 %v548_v2 }
  0x73   :  { %1023 = vmatprep.subr.mxu0 %v547_v3 }
  0x74   :  { %1024 = vmatpush3.msra.mxu0 %v547_v3 }
  0x75   :  { %1025 = vmatprep.subr.mxu0 %v546_v4 }
  0x76   :  { %1026 = vmatpush3.msra.mxu0 %v546_v4 }
  0x77   :  { %1027 = vmatprep.subr.mxu0 %v545_v5 }
  0x78   :  { %1028 = vmatpush3.msra.mxu0 %v545_v5 }
  0x79   :  { %1029 = vmatprep.subr.mxu0 %v544_v6 }
  0x7a   :  { %1030 = vmatpush3.msra.mxu0 %v544_v6 }
  0x7b   :  { %1031 = vmatprep.subr.mxu0 %v543_v7 }
  0x7c   :  { %1032 = vmatpush3.msra.mxu0 %v543_v7 }
  0x7d   :  { %1034 = vmatmul.mubr.f32.vlgmr.msra.gmra.mxu0 %v540_v9 }
  0x7e   :  { %1036 = vmatprep.mubr.f32.mxu0 %v541_v10 }
  0x81   :  { %1037 = vmatmul.mubr.f32.gmra.mxu0 %v542_v11 }
  0xd6   :  { %v313_v20 = vpop.permute.xlu0 %312 }
  0xd7   :  { %vm326_vm1 = vcmp.eq.s32.totalorder %v313_v20, %v305_v16  ;;  %v319_v27 = vpop.permute.xlu1 %318 }
  0xd8   :  { %v791_v25 = vsel %vm326_vm1, 1.0, %v1224_v0  ;;  %vm328_vm4 = vcmp.eq.s32.totalorder %v319_v27, %v305_v16 }
  0xd9   :  { %v793_v29 = vsel %vm328_vm4, 1.0, %v1224_v0 }
  0xda   :  { %v316_v26 = vpop.permute.xlu0 %315 }
  0xdb   :  { %vm327_vm3 = vcmp.eq.s32.totalorder %v316_v26, %v305_v16  ;;  %v322_v30 = vpop.permute.xlu1 %321 }
  0xdc   :  { %v792_v28 = vsel %vm327_vm3, 1.0, %v1224_v0  ;;  %vm329_vm5 = vcmp.eq.s32.totalorder %v322_v30, %v305_v16 }
  0xdd   :  { %v794_v32 = vsel %vm329_vm5, 1.0, %v1224_v0 }
  0xde   :  { %v325_v31 = vpop.permute.xlu0 %324 }
  0xdf   :  { %vm330_vm6 = vcmp.eq.s32.totalorder %v325_v31, %v305_v16 }
  0xe0   :  { %v795_v33 = vsel %vm330_vm6, 1.0, %v1224_v0 }
 0x119   :  { %v184_v43 = vpop.f32.mrf.mxu0 }
 0x11a   :  { %v185_v44 = vadd.f32 %v789_v42, %v184_v43  ;;  %v805_v43 = vld [vmem:[%s1555_s10] ss:$0 sm:$0xff] }
 0x11b   :  { %v919_v45 = vpop.f32.mrf.mxu0  ;;  %vm661_vm8 = vcmp.eq.s32.totalorder %v805_v43, %v448_v40 }
 0x11c   :  { %v198_v46 = vmax.f32 %v185_v44, 0.0  ;;  %v806_v45 = vsel %vm661_vm8, 1.0, %v1224_v0 }
 0x11d   :  { %v189_v47 = vpop.f32.mrf.mxu0 }
 0x11e   :  { %v190_v48 = vadd.f32 %v789_v42, %v189_v47  ;;  %959 = vmatmul.mubr.f32.vlgmr.msra.gmra.mxu1 %v198_v46  ;;  %v738_v47 = vsel %vm664_vm10, %v806_v45, 0.0 }
 0x11f   :  { %v922_v49 = vpop.f32.mrf.mxu0  ;;  %961 = vmatprep.mubr.msk.f32.mxu1 %vm1225_vm0, %v1224_v0  ;;  %739 = vadd.xlane.f32.xlu0 %v738_v47 }
 0x120   :  { %v199_v50 = vmax.f32 %v190_v48, 0.0 }
 0x121   :  { %v194_v51 = vpop.f32.mrf.mxu0 }
 0x122   :  { %v195_v52 = vadd.f32 %v789_v42, %v194_v51  ;;  %962 = vmatmul.mubr.f32.gmra.mxu1 %v199_v50  ;;  %v801_v42 = vld [vmem:[%s1551_s6] ss:$0 sm:$0xff]  ;;  %s1227_s6 = smov [#allocation11]  }
 0x123   :  { %v925_v53 = vpop.f32.mrf.mxu0  ;;  %964 = vmatprep.mubr.msk.f32.mxu1 %vm1225_vm0, %v1224_v0  ;;  %vm455_vm7 = vcmp.eq.s32.totalorder %v801_v42, %v449_v41  ;;  %s761_s10 = sshll.u32 %s1227_s6, 4  ;;  %s762_s10 = int_to_ptr.vmem [resolvable:$true] %s761_s10 }
 0x124   :  { %v200_v54 = vmax.f32 %v195_v52, 0.0  ;;  %v802_v44 = vsel %vm455_vm7, 1.0, %v1224_v0  ;;  %s1148_s14 = scalar_lea.vmem %s762_s10, 128  ;;  %p1153_p7 = scmp.lt.s32.totalorder %s762_s10, %s762_s10 }
 0x125   :  { %v532_v46 = vsel %vm458_vm9, %v802_v44, 0.0  ;;  %p1149_p6 = scmp.ne.s32.totalorder %s762_s10, %s1148_s14  ;;  %p1154_p8 = scmp.lt.s32.totalorder %s1148_s14, %s1148_s14 }
 0x126   :  { %965 = vmatmul.mubr.f32.gmra.mxu1 %v200_v54  ;;  %533 = vadd.xlane.f32.xlu1 %v532_v46 }
 0x127   :  { %973 = vmatprep.mubr.msk.f32.mxu1 %vm1225_vm0, %v1224_v0  ;;  %p1155_p9 = por %p1154_p8, %p1153_p7 }
 0x129   :  { %p1156_p10 = pnand %p1155_p9, %p1149_p6 }
 0x13d   :  { %v1035_v34 = vpop.f32.mrf.mxu0 }
 0x13e   :  { %v638_v37 = vadd.f32 %v1035_v34, %v804_v35 }
 0x13f   :  { %v632_v36 = vpop.f32.mrf.mxu0 }
 0x140   :  { %v633_v38 = vadd.f32 %v804_v35, %v632_v36  ;;  %v652_v1 = vmax.f32 %v638_v37, 0.0 }
 0x141   :  { %v1038_v57 = vpop.f32.mrf.mxu0 }
 0x142   :  { %v651_v39 = vmax.f32 %v633_v38, 0.0  ;;  %v648_v59 = vadd.f32 %v1038_v57, %v804_v35 }
 0x143   :  { %v642_v60 = vpop.f32.mrf.mxu0 }
 0x144   :  { %655 = vst [vmem:[#allocation11] sm:$0xff] %v651_v39  ;;  %v654_v61 = vmax.f32 %v648_v59, 0.0  ;;  %v643_v62 = vadd.f32 %v804_v35, %v642_v60 }
 0x146   :  { %v653_v63 = vmax.f32 %v643_v62, 0.0 }
 0x1de   :  { %v290_v12 = vpop.f32.mrf.mxu1 }
 0x1df   :  { %v291_v24 = vadd.f32 %v790_v18, %v290_v12 }
 0x1e0   :  { %v960_v13 = vpop.f32.mrf.mxu1 }
 0x1e2   :  { %v295_v15 = vpop.f32.mrf.mxu1 }
 0x1e3   :  { %v296_v23 = vadd.f32 %v790_v18, %v295_v15 }
 0x1e4   :  { %v963_v17 = vpop.f32.mrf.mxu1 }
 0x1e6   :  { %v300_v19 = vpop.f32.mrf.mxu1 }
 0x1e7   :  { %v301_v21 = vadd.f32 %v790_v18, %v300_v19 }
 0x1e8   :  { %v966_v22 = vpop.f32.mrf.mxu1 }
 0x1e9   :  { %968 = vmatpush3.msra.mxu1 %v301_v21 }
 0x1ea   :  { %969 = vmatprep.subr.mxu1 %v1224_v0 }
 0x1eb   :  { %970 = vmatpush3.msra.mxu1 %v296_v23 }
 0x1ec   :  { %971 = vmatprep.subr.mxu1 %v1224_v0 }
 0x1ed   :  { %972 = vmatpush3.msra.mxu1 %v291_v24 }
 0x1ee   :  { %974 = vmatmul.mubr.msk.f32.vlgmr.msra.gmra.mxu1 %vm341_vm2, %v791_v25  ;;  %988 = vmatprep.subr.mxu1 %v1224_v0 }
 0x1ef   :  { %976 = vmatprep.mubr.msk.f32.mxu1 %vm1225_vm0, %v1224_v0 }
 0x1f2   :  { %977 = vmatmul.mubr.msk.f32.gmra.mxu1 %vm341_vm2, %v792_v28 }
 0x1f3   :  { %979 = vmatprep.mubr.msk.f32.mxu1 %vm1225_vm0, %v1224_v0 }
 0x1f6   :  { %980 = vmatmul.mubr.msk.f32.gmra.mxu1 %vm341_vm2, %v793_v29 }
 0x1f7   :  { %982 = vmatprep.mubr.msk.f32.mxu1 %vm1225_vm0, %v1224_v0 }
 0x1fa   :  { %983 = vmatmul.mubr.msk.f32.gmra.mxu1 %vm341_vm2, %v794_v32 }
 0x1fb   :  { %985 = vmatprep.mubr.msk.f32.mxu1 %vm1225_vm0, %v1224_v0 }
 0x1fe   :  { %986 = vmatmul.mubr.msk.f32.gmra.mxu1 %vm341_vm2, %v795_v33 }
 0x1ff   :  { %998 = vmatprep.mubr.msk.f32.mxu1 %vm1225_vm0, %v1224_v0 }
 0x2ae   :  { %v423_v48 = vpop.f32.mrf.mxu1 }
 0x2b0   :  { %v975_v49 = vpop.f32.mrf.mxu1 }
 0x2b2   :  { %v428_v50 = vpop.f32.mrf.mxu1 }
 0x2b4   :  { %v978_v51 = vpop.f32.mrf.mxu1 }
 0x2b6   :  { %v433_v52 = vpop.f32.mrf.mxu1 }
 0x2b8   :  { %v981_v53 = vpop.f32.mrf.mxu1 }
 0x2ba   :  { %v438_v54 = vpop.f32.mrf.mxu1 }
 0x2bc   :  { %v984_v55 = vpop.f32.mrf.mxu1 }
 0x2be   :  { %v443_v56 = vpop.f32.mrf.mxu1 }
 0x2bf   :  { %989 = vmatpush3.msra.mxu1 %v443_v56 }
 0x2c0   :  { %v987_v58 = vpop.f32.mrf.mxu1  ;;  %990 = vmatprep.subr.mxu1 %v1224_v0 }
 0x2c1   :  { %991 = vmatpush3.msra.mxu1 %v438_v54 }
 0x2c2   :  { %992 = vmatprep.subr.mxu1 %v1224_v0 }
 0x2c3   :  { %993 = vmatpush3.msra.mxu1 %v433_v52 }
 0x2c4   :  { %994 = vmatprep.subr.mxu1 %v1224_v0 }
 0x2c5   :  { %995 = vmatpush3.msra.mxu1 %v428_v50 }
 0x2c6   :  { %996 = vmatprep.subr.mxu1 %v1224_v0 }
 0x2c7   :  { %997 = vmatpush3.msra.mxu1 %v423_v48 }
 0x2c8   :  { %1039 = vmatprep.subr.mxu1 %v1224_v0  ;;  %999 = vmatmul.mubr.msk.f32.vlgmr.msra.gmra.mxu1 %vm458_vm9, %v802_v44 }
 0x2c9   :  { %1040 = vmatpush3.msra.mxu1 %v654_v61  ;;  %1047 = vmatprep.mubr.msk.f32.mxu1 %vm1225_vm0, %v1224_v0 }
 0x2ca   :  { %1041 = vmatprep.subr.mxu1 %v1224_v0 }
 0x2cb   :  { %1042 = vmatpush3.msra.mxu1 %v653_v63 }
 0x2cc   :  { %1043 = vmatprep.subr.mxu1 %v1224_v0 }
 0x2cd   :  { %1044 = vmatpush3.msra.mxu1 %v652_v1 }
 0x2ce   :  { %1045 = vmatprep.subr.mxu1 %v1224_v0 }
 0x2cf   :  { %1046 = vmatpush3.msra.mxu1 %v651_v39 }
 0x2d0   :  { %1048 = vmatmul.mubr.msk.f32.vlgmr.msra.gmra.mxu1 %vm664_vm10, %v806_v45 }
 0x2d1   :  { %1159 = shalt.err (!%p1156_p10)
}
 0x2d2   :  { %764 = dma.vmem_to_hbm [thread:$0]  %s762_s10, 128, %s1557_s12, [#allocation12]   ;;  %v534_v2 = vpop.xlane.xlu1 %533  ;;  %v740_v0 = vpop.xlane.xlu0 %739 }
 0x2d3   :  { %v535_v3 = vadd.f32 1.0, %v534_v2  ;;  %v741_v4 = vadd.f32 1.0, %v740_v0  ;;  %s1228_s17 = smov [#allocation10]  }
 0x2d4   :  { %s751_s0 = sshll.u32 %s1228_s17, 4  ;;  %s752_s0 = int_to_ptr.vmem [resolvable:$true] %s751_s0 }
 0x2d5   :  { %1064 = vrcp.f32 %v535_v3  ;;  %s1168_s18 = scalar_lea.vmem %s752_s0, 128  ;;  %p1173_p12 = scmp.lt.s32.totalorder %s752_s0, %s752_s0 }
 0x2d6   :  { %1066 = vrcp.f32 %v741_v4  ;;  %p1169_p11 = scmp.ne.s32.totalorder %s752_s0, %s1168_s18  ;;  %p1174_p13 = scmp.lt.s32.totalorder %s1168_s18, %s1168_s18 }
 0x2d8   :  { %p1175_p0 = por %p1174_p13, %p1173_p12 }
 0x2da   :  { %p1176_p1 = pnand %p1175_p0, %p1169_p11 }
 0x2e2   :  { %v1065_v5 = vpop.eup %1064 }
 0x388   :  { %v528_v6 = vpop.f32.mrf.mxu1 }
 0x389   :  { %v537_v7 = vmul.f32 %v1065_v5, %v528_v6 }
 0x38a   :  { %v1000_v8 = vpop.f32.mrf.mxu1 }
 0x38b   :  { %538 = vst [vmem:[#allocation10] sm:$0xff] %v537_v7 }
 0x38c   :  { %1179 = shalt.err (!%p1176_p1)
}
 0x38d   :  { %754 = dma.vmem_to_hbm [thread:$0]  %s752_s0, 128, %s1556_s11, [#allocation4]   ;;  %v1067_v9 = vpop.eup %1066 }
 0x38e   :  { %s1229_s20 = smov [#allocation13]  }
 0x38f   :  { %s771_s21 = sshll.u32 %s1229_s20, 4  ;;  %s772_s21 = int_to_ptr.vmem [resolvable:$true] %s771_s21 }
 0x390   :  { %v734_v10 = vpop.f32.mrf.mxu1  ;;  %s1188_s22 = scalar_lea.vmem %s772_s21, 128  ;;  %p1193_p3 = scmp.lt.s32.totalorder %s772_s21, %s772_s21 }
 0x391   :  { %v743_v11 = vmul.f32 %v1067_v9, %v734_v10  ;;  %p1189_p2 = scmp.ne.s32.totalorder %s772_s21, %s1188_s22  ;;  %p1194_p4 = scmp.lt.s32.totalorder %s1188_s22, %s1188_s22 }
 0x392   :  { %v1049_v12 = vpop.f32.mrf.mxu1 }
 0x393   :  { %744 = vst [vmem:[#allocation13] sm:$0xff] %v743_v11  ;;  %p1195_p5 = por %p1194_p4, %p1193_p3 }
 0x395   :  { %p1196_p6 = pnand %p1195_p5, %p1189_p2 }
 0x397   :  { %1199 = shalt.err (!%p1196_p6)
}
 0x398   :  { %774 = dma.vmem_to_hbm [thread:$0]  %s772_s21, 128, %s1558_s13, [#allocation12]  }
 0x399   :  { %1214 = dma.done.wait [#allocation4], 128  }
 0x39a   :  { %1215 = vsyncadd [#allocation4], 4294967168 }
 0x39b   :  { %1216 = dma.done.wait [#allocation12], 256  }
 0x39c   :  { %1217 = vsyncadd [#allocation12], 4294967040 }
 0x39d   :  { %784 = vsyncpa [#allocation3], 1 }
 0x39e   :  { %785 = vsyncpa [#allocation6], 1 }
 0x39f   :  { %786 = vsyncpa [#allocation9], 1 }
 0x3a0   :  { %787 = vsyncpa [#allocation4], 1 }
 0x3a1   :  { %788 = vsyncpa [#allocation12], 1 }

</bundles_post_ra>
